<compile_context>
chip_gen: v7x
topology: tpu7x:2x2x1
jax: 0.10.0
libtpu: 0.0.40
codegen_flags: <defaults>
</compile_context>

<pallas_src>
import jax
import jax.numpy as jnp
from jax import lax
from jax.experimental import pallas as pl
from jax.experimental.pallas import tpu as pltpu


def _make_fused_kernel(H, W, dilations, n_scales, matmul_dtype):
    """Builds the fused RSI forward kernel (one image per grid step)."""
    HW = H * W
    n_conv = len(dilations)
    head_start = n_conv - n_scales

    def kernel(*refs):
        x_ref = refs[0]                                   # (1, Cin, H*W)
        pos = 1
        conv_w, conv_b = [], []
        for _ in range(n_conv):
            conv_w.append(refs[pos])                      # (9, co, ci)
            conv_b.append(refs[pos + 1])                  # (co, 1)  f32
            pos += 2
        head_w = refs[pos:pos + n_scales]                 # each (DC, c_s)
        pos += n_scales
        bh_ref = refs[pos]                                # (DC, 1) f32
        o_ref = refs[pos + 1]                             # (1, DC, H*W)

        # Lane-index masks for the edge-replicated (clamped) shifts; computed once.
        lane = lax.broadcasted_iota(jnp.int32, (1, HW), 1)
        colj = lane % W
        first_row = lane < W
        last_row = lane >= (H - 1) * W
        first_col = colj == 0
        last_col = colj == (W - 1)

        def clamp_sample(x, step, n, forward, keep_mask):
            # forward:  result[k] = x[clip(k + n*step)]   (clamped at the high edge)
            # backward: result[k] = x[clip(k - n*step)]   (clamped at the low edge)
            shift = (HW - step) if forward else step
            for _ in range(n):
                x = jnp.where(keep_mask, x, pltpu.roll(x, shift, axis=1))
            return x

        act = x_ref[0].astype(jnp.float32)                # (Cin, H*W), rolls in f32
        acc = None                                        # fused-head accumulator (DC, H*W)
        for i in range(n_conv):
            d = dilations[i]
            w_ref, b_ref = conv_w[i], conv_b[i]

            # 3 vertical taps (row - d, row, row + d), edge-replicated.
            v_taps = (clamp_sample(act, W, d, False, first_row),
                      act,
                      clamp_sample(act, W, d, True, last_row))
            y = None
            for ky in range(3):
                v = v_taps[ky]
                # 3 horizontal taps (col - d, col, col + d), edge-replicated.
                h_taps = (clamp_sample(v, 1, d, False, first_col),
                          v,
                          clamp_sample(v, 1, d, True, last_col))
                for kx in range(3):
                    wt = w_ref[ky * 3 + kx]               # (co, ci)
                    patch = h_taps[kx].astype(matmul_dtype)
                    part = jnp.dot(wt, patch, preferred_element_type=jnp.float32)
                    y = part if y is None else y + part   # (co, H*W) f32
            y = jnp.maximum(y + b_ref[...], 0.0)          # bias + ReLU in f32

            # Fold the (multiscale) 1x1 heads into the loop: accumulate immediately.
            if i >= head_start:
                hk = head_w[i - head_start]
                part = jnp.dot(hk[...], y.astype(matmul_dtype),
                               preferred_element_type=jnp.float32)   # (DC, H*W)
                acc = part if acc is None else acc + part
            act = y                                       # next conv input (f32)

        out = jnp.maximum(acc + bh_ref[...], 0.0)         # (DC, H*W), lane-dense
        o_ref[0] = out.astype(o_ref.dtype)

    return kernel


def recurrent_init_forward(params, x_nchw, dilations, multiscale_depth,
                           matmul_dtype=jnp.float32):
    """Fused RecurrentInit forward. Returns (B, out_channels, H, W, depth)."""
    B, Cin, H, W = x_nchw.shape
    HW = H * W
    dil = tuple(int(d) for d in dilations)
    # NCHW -> (B, C, H*W) is a pure reshape (no transpose); spatial goes on lanes.
    x_flat = x_nchw.reshape(B, Cin, HW).astype(matmul_dtype)

    conv_ws, conv_bs, in_chs, out_chs = [], [], [], []
    for (w, b) in params["conv_blocks"]:
        _, _, ci, co = w.shape
        in_chs.append(int(ci))
        out_chs.append(int(co))
        # (3,3,ci,co) HWIO -> per-tap (co, ci) for (co,ci)@(ci,H*W) spatial-last matmuls.
        conv_ws.append(jnp.transpose(w.reshape(9, ci, co), (0, 2, 1)).astype(matmul_dtype))
        conv_bs.append(b.reshape(co, 1).astype(jnp.float32))
    n_conv = len(conv_ws)

    depth = len(params["out_blocks"])
    out_channels = int(params["out_blocks"][0][0].shape[1])
    DC = depth * out_channels
    msd = int(multiscale_depth)
    n_scales = msd if msd > 1 else 1
    scale_ids = list(range(n_conv - n_scales, n_conv))

    # Head weights, head-major output ordering (row = head*out_ch + ch), pre-split per
    # contributing scale so the kernel never slices at a lane offset.
    wout_T = jnp.transpose(
        jnp.concatenate([w for (w, _) in params["out_blocks"]], axis=1))   # (DC, Ccat)
    head_ws, off = [], 0
    for si in scale_ids:
        c = out_chs[si]
        head_ws.append(wout_T[:, off:off + c].astype(matmul_dtype))
        off += c
    bout = jnp.concatenate([b for (_, b) in params["out_blocks"]],
                           axis=0).reshape(DC, 1).astype(jnp.float32)

    kernel = _make_fused_kernel(H, W, dil, n_scales, matmul_dtype)

    in_specs = [pl.BlockSpec((1, Cin, HW), lambda b: (b, 0, 0))]
    args = [x_flat]
    for wf, bf in zip(conv_ws, conv_bs):
        in_specs.append(pl.BlockSpec(tuple(wf.shape), lambda b: (0, 0, 0)))
        in_specs.append(pl.BlockSpec(tuple(bf.shape), lambda b: (0, 0)))
        args += [wf, bf]
    for hw_ in head_ws:
        in_specs.append(pl.BlockSpec(tuple(hw_.shape), lambda b: (0, 0)))
        args.append(hw_)
    in_specs.append(pl.BlockSpec(tuple(bout.shape), lambda b: (0, 0)))
    args.append(bout)

    flops = sum(2 * HW * 9 * ci * co for ci, co in zip(in_chs, out_chs))
    flops += 2 * HW * sum(out_chs[s] for s in scale_ids) * DC
    flops *= B
    bytes_accessed = int(sum(int(a.size) * a.dtype.itemsize for a in args)
                         + B * DC * HW * 4)

    # TODO(synk): for production MRI image sizes add an H-tiled "parallel" grid axis
    # (halo = max dilation) plus an explicit vmem_limit_bytes so v7x (64 MiB VMEM,
    # 2 TensorCores) stays covered even at B == 1.
    y = pl.pallas_call(
        kernel,
        out_shape=jax.ShapeDtypeStruct((B, DC, HW), jnp.float32),
        grid=(B,),
        in_specs=in_specs,
        out_specs=pl.BlockSpec((1, DC, HW), lambda b: (b, 0, 0)),
        compiler_params=pltpu.CompilerParams(dimension_semantics=("parallel",)),
        cost_estimate=pl.CostEstimate(flops=int(flops), transcendentals=0,
                                      bytes_accessed=bytes_accessed),
    )(*args)

    # (B, depth*out_ch, H*W) head-major -> (B, out_ch, H, W, depth). Small XLA permute.
    out = y.reshape(B, depth, out_channels, H, W)
    return jnp.transpose(out, (0, 2, 3, 4, 1))


def init_params(key, in_channels, out_channels, channels, dilations, depth,
                multiscale_depth):
    """Deterministic synthetic parameters (shapes follow the PyTorch __init__)."""
    params = {"conv_blocks": [], "out_blocks": []}
    tch = in_channels
    for curr_channels in channels:
        key, k1, k2 = jax.random.split(key, 3)
        bound = 1.0 / jnp.sqrt(tch * 9)
        w = jax.random.uniform(k1, (3, 3, tch, curr_channels), jnp.float32,
                               -bound, bound)            # HWIO
        b = jax.random.uniform(k2, (curr_channels,), jnp.float32, -bound, bound)
        params["conv_blocks"].append((w, b))
        tch = curr_channels
    tch = int(sum(channels[-multiscale_depth:]))
    for _ in range(depth):
        key, k1, k2 = jax.random.split(key, 3)
        bound = 1.0 / jnp.sqrt(tch)
        w = jax.random.uniform(k1, (tch, out_channels), jnp.float32, -bound, bound)
        b = jax.random.uniform(k2, (out_channels,), jnp.float32, -bound, bound)
        params["out_blocks"].append((w, b))
    return params


def _reference_forward(params, x_nchw, dilations, multiscale_depth):
    """Pure-JAX reference for correctness check."""
    x = jnp.transpose(x_nchw, (0, 2, 3, 1)).astype(jnp.float32)
    features = []
    for (w, b), d in zip(params["conv_blocks"], dilations):
        d = int(d)
        xpad = jnp.pad(x, ((0, 0), (d, d), (d, d), (0, 0)), mode="edge")
        y = lax.conv_general_dilated(
            xpad, w, window_strides=(1, 1), padding="VALID",
            rhs_dilation=(d, d),
            dimension_numbers=("NHWC", "HWIO", "NHWC"))
        x = jnp.maximum(y + b, 0.0)
        if multiscale_depth > 1:
            features.append(x)
    if multiscale_depth > 1:
        x = jnp.concatenate(features[-multiscale_depth:], axis=-1)
    outs = []
    for (w, b) in params["out_blocks"]:
        y = jnp.maximum(jnp.einsum("bhwc,cd->bhwd", x, w) + b, 0.0)
        outs.append(jnp.transpose(y, (0, 3, 1, 2)))
    return jnp.stack(outs, axis=-1)


if __name__ == "__main__":
    in_channels = 4
    out_channels = 8
    channels = (8, 12)
    dilations = (1, 2)
    depth = 2

    key = jax.random.PRNGKey(0)
    kparam, kx = jax.random.split(key)
    x = jax.random.normal(kx, (2, in_channels, 16, 16), jnp.float32)

    # Test single-scale and multiscale paths, with f32 and bf16 MXU inputs.
    for multiscale_depth in (1, 2):
        params = init_params(kparam, in_channels, out_channels, channels,
                             dilations, depth, multiscale_depth)
        ref = _reference_forward(params, x, dilations, multiscale_depth)
        for md, tol in ((jnp.float32, 1e-4), (jnp.bfloat16, 1e-1)):
            out = recurrent_init_forward(params, x, dilations, multiscale_depth,
                                         matmul_dtype=md)
            out = jax.block_until_ready(out)
            assert out.shape == (2, out_channels, 16, 16, depth), out.shape
            err = float(jnp.max(jnp.abs(out - ref)))
            assert err < tol, (str(md), err)

    print("KERNEL_OK")
</pallas_src>

<mosaic_0001>
module attributes {stable_mosaic.version = 11 : i64} {
  func.func @kernel(%arg0: i32, %arg1: memref<1x4x256xf32, #tpu.memory_space<vmem>>, %arg2: memref<9x8x4xf32, #tpu.memory_space<vmem>>, %arg3: memref<8x1xf32, #tpu.memory_space<vmem>>, %arg4: memref<9x12x8xf32, #tpu.memory_space<vmem>>, %arg5: memref<12x1xf32, #tpu.memory_space<vmem>>, %arg6: memref<16x12xf32, #tpu.memory_space<vmem>>, %arg7: memref<16x1xf32, #tpu.memory_space<vmem>>, %arg8: memref<1x16x256xf32, #tpu.memory_space<vmem>>) attributes {dimension_semantics = [#tpu.dimension_semantics<parallel>], iteration_bounds = array<i64: 2>, scalar_prefetch = 0 : i64, scratch_operands = 0 : i64, tpu.core_type = #tpu.core_type<tc>, window_params = [{transform_indices = @transform_0, window_bounds = array<i64: 1, 4, 256>}, {pipeline_mode = #tpu.pipeline_mode<synchronous>, transform_indices = @transform_1, window_bounds = array<i64: 9, 8, 4>}, {pipeline_mode = #tpu.pipeline_mode<synchronous>, transform_indices = @transform_2, window_bounds = array<i64: 8, 1>}, {pipeline_mode = #tpu.pipeline_mode<synchronous>, transform_indices = @transform_3, window_bounds = array<i64: 9, 12, 8>}, {pipeline_mode = #tpu.pipeline_mode<synchronous>, transform_indices = @transform_4, window_bounds = array<i64: 12, 1>}, {pipeline_mode = #tpu.pipeline_mode<synchronous>, transform_indices = @transform_5, window_bounds = array<i64: 16, 12>}, {pipeline_mode = #tpu.pipeline_mode<synchronous>, transform_indices = @transform_6, window_bounds = array<i64: 16, 1>}, {transform_indices = @transform_7, window_bounds = array<i64: 1, 16, 256>}]} {
    %0 = tpu.iota {dimensions = array<i32: 1>} : vector<1x256xi32>
    %c16_i32 = arith.constant 16 : i32
    %c0_i32 = arith.constant 0 : i32
    %1 = arith.cmpi eq, %c16_i32, %c0_i32 : i32
    %c1_i32 = arith.constant 1 : i32
    %2 = arith.select %1, %c1_i32, %c16_i32 : i32
    %3 = vector.broadcast %2 : i32 to vector<1x256xi32>
    %4 = arith.remsi %0, %3 : vector<1x256xi32>
    %c0_i32_0 = arith.constant 0 : i32
    %5 = vector.broadcast %c0_i32_0 : i32 to vector<1x256xi32>
    %6 = arith.cmpi ne, %4, %5 : vector<1x256xi32>
    %c0_i32_1 = arith.constant 0 : i32
    %7 = vector.broadcast %c0_i32_1 : i32 to vector<1x256xi32>
    %8 = arith.cmpi slt, %4, %7 : vector<1x256xi32>
    %c0_i32_2 = arith.constant 0 : i32
    %9 = arith.cmpi slt, %2, %c0_i32_2 : i32
    %10 = vector.broadcast %9 : i1 to vector<1x256xi1>
    %11 = vector.broadcast %10 : vector<1x256xi1> to vector<1x256xi1>
    %12 = arith.xori %8, %11 : vector<1x256xi1>
    %13 = arith.andi %12, %6 : vector<1x256xi1>
    %14 = vector.broadcast %2 : i32 to vector<1x256xi32>
    %15 = arith.addi %4, %14 : vector<1x256xi32>
    %16 = arith.select %13, %15, %4 : vector<1x256xi1>, vector<1x256xi32>
    %c16_i32_3 = arith.constant 16 : i32
    %17 = vector.broadcast %c16_i32_3 : i32 to vector<1x256xi32>
    %18 = arith.cmpi slt, %0, %17 : vector<1x256xi32>
    %c240_i32 = arith.constant 240 : i32
    %19 = vector.broadcast %c240_i32 : i32 to vector<1x256xi32>
    %20 = arith.cmpi sge, %0, %19 : vector<1x256xi32>
    %c0_i32_4 = arith.constant 0 : i32
    %21 = vector.broadcast %c0_i32_4 : i32 to vector<1x256xi32>
    %22 = arith.cmpi eq, %16, %21 : vector<1x256xi32>
    %c15_i32 = arith.constant 15 : i32
    %23 = vector.broadcast %c15_i32 : i32 to vector<1x256xi32>
    %24 = arith.cmpi eq, %16, %23 : vector<1x256xi32>
    %c0 = arith.constant 0 : index
    %c0_5 = arith.constant 0 : index
    %c0_6 = arith.constant 0 : index
    %25 = vector.load %arg1[%c0, %c0_5, %c0_6] : memref<1x4x256xf32, #tpu.memory_space<vmem>>, vector<1x4x256xf32>
    %26 = vector.shape_cast %25 : vector<1x4x256xf32> to vector<4x256xf32>
    %c16_i32_7 = arith.constant 16 : i32
    %27 = tpu.dynamic_rotate %26 by %c16_i32_7 dim 1 : vector<4x256xf32>, i32 -> vector<4x256xf32>
    %28 = vector.shape_cast %18 : vector<1x256xi1> to vector<1x256xi1>
    %29 = vector.broadcast %28 : vector<1x256xi1> to vector<4x256xi1>
    %30 = arith.select %29, %26, %27 : vector<4x256xi1>, vector<4x256xf32>
    %c240_i32_8 = arith.constant 240 : i32
    %31 = tpu.dynamic_rotate %26 by %c240_i32_8 dim 1 : vector<4x256xf32>, i32 -> vector<4x256xf32>
    %32 = vector.shape_cast %20 : vector<1x256xi1> to vector<1x256xi1>
    %33 = vector.broadcast %32 : vector<1x256xi1> to vector<4x256xi1>
    %34 = arith.select %33, %26, %31 : vector<4x256xi1>, vector<4x256xf32>
    %c1_i32_9 = arith.constant 1 : i32
    %35 = tpu.dynamic_rotate %30 by %c1_i32_9 dim 1 : vector<4x256xf32>, i32 -> vector<4x256xf32>
    %36 = vector.shape_cast %22 : vector<1x256xi1> to vector<1x256xi1>
    %37 = vector.broadcast %36 : vector<1x256xi1> to vector<4x256xi1>
    %38 = arith.select %37, %30, %35 : vector<4x256xi1>, vector<4x256xf32>
    %c255_i32 = arith.constant 255 : i32
    %39 = tpu.dynamic_rotate %30 by %c255_i32 dim 1 : vector<4x256xf32>, i32 -> vector<4x256xf32>
    %40 = vector.shape_cast %24 : vector<1x256xi1> to vector<1x256xi1>
    %41 = vector.broadcast %40 : vector<1x256xi1> to vector<4x256xi1>
    %42 = arith.select %41, %30, %39 : vector<4x256xi1>, vector<4x256xf32>
    %c0_10 = arith.constant 0 : index
    %c0_11 = arith.constant 0 : index
    %c0_12 = arith.constant 0 : index
    %43 = vector.load %arg2[%c0_10, %c0_11, %c0_12] : memref<9x8x4xf32, #tpu.memory_space<vmem>>, vector<1x8x4xf32>
    %44 = vector.shape_cast %43 : vector<1x8x4xf32> to vector<8x4xf32>
    %cst = arith.constant dense<0.000000e+00> : vector<8x256xf32>
    %45 = tpu.matmul %44, %38, %cst {dimension_numbers = #tpu.dot_dimension_numbers<[1], [0], [0], [1], [0, 0, 1, 1], [], []>} : vector<8x4xf32>, vector<4x256xf32>, vector<8x256xf32> -> vector<8x256xf32>
    %c1 = arith.constant 1 : index
    %c0_13 = arith.constant 0 : index
    %c0_14 = arith.constant 0 : index
    %46 = vector.load %arg2[%c1, %c0_13, %c0_14] : memref<9x8x4xf32, #tpu.memory_space<vmem>>, vector<1x8x4xf32>
    %47 = vector.shape_cast %46 : vector<1x8x4xf32> to vector<8x4xf32>
    %cst_15 = arith.constant dense<0.000000e+00> : vector<8x256xf32>
    %48 = tpu.matmul %47, %30, %cst_15 {dimension_numbers = #tpu.dot_dimension_numbers<[1], [0], [0], [1], [0, 0, 1, 1], [], []>} : vector<8x4xf32>, vector<4x256xf32>, vector<8x256xf32> -> vector<8x256xf32>
    %49 = arith.addf %45, %48 : vector<8x256xf32>
    %c2 = arith.constant 2 : index
    %c0_16 = arith.constant 0 : index
    %c0_17 = arith.constant 0 : index
    %50 = vector.load %arg2[%c2, %c0_16, %c0_17] : memref<9x8x4xf32, #tpu.memory_space<vmem>>, vector<1x8x4xf32>
    %51 = vector.shape_cast %50 : vector<1x8x4xf32> to vector<8x4xf32>
    %cst_18 = arith.constant dense<0.000000e+00> : vector<8x256xf32>
    %52 = tpu.matmul %51, %42, %cst_18 {dimension_numbers = #tpu.dot_dimension_numbers<[1], [0], [0], [1], [0, 0, 1, 1], [], []>} : vector<8x4xf32>, vector<4x256xf32>, vector<8x256xf32> -> vector<8x256xf32>
    %53 = arith.addf %49, %52 : vector<8x256xf32>
    %c1_i32_19 = arith.constant 1 : i32
    %54 = tpu.dynamic_rotate %26 by %c1_i32_19 dim 1 : vector<4x256xf32>, i32 -> vector<4x256xf32>
    %55 = vector.shape_cast %22 : vector<1x256xi1> to vector<1x256xi1>
    %56 = vector.broadcast %55 : vector<1x256xi1> to vector<4x256xi1>
    %57 = arith.select %56, %26, %54 : vector<4x256xi1>, vector<4x256xf32>
    %c255_i32_20 = arith.constant 255 : i32
    %58 = tpu.dynamic_rotate %26 by %c255_i32_20 dim 1 : vector<4x256xf32>, i32 -> vector<4x256xf32>
    %59 = vector.shape_cast %24 : vector<1x256xi1> to vector<1x256xi1>
    %60 = vector.broadcast %59 : vector<1x256xi1> to vector<4x256xi1>
    %61 = arith.select %60, %26, %58 : vector<4x256xi1>, vector<4x256xf32>
    %c3 = arith.constant 3 : index
    %c0_21 = arith.constant 0 : index
    %c0_22 = arith.constant 0 : index
    %62 = vector.load %arg2[%c3, %c0_21, %c0_22] : memref<9x8x4xf32, #tpu.memory_space<vmem>>, vector<1x8x4xf32>
    %63 = vector.shape_cast %62 : vector<1x8x4xf32> to vector<8x4xf32>
    %cst_23 = arith.constant dense<0.000000e+00> : vector<8x256xf32>
    %64 = tpu.matmul %63, %57, %cst_23 {dimension_numbers = #tpu.dot_dimension_numbers<[1], [0], [0], [1], [0, 0, 1, 1], [], []>} : vector<8x4xf32>, vector<4x256xf32>, vector<8x256xf32> -> vector<8x256xf32>
    %65 = arith.addf %53, %64 : vector<8x256xf32>
    %c4 = arith.constant 4 : index
    %c0_24 = arith.constant 0 : index
    %c0_25 = arith.constant 0 : index
    %66 = vector.load %arg2[%c4, %c0_24, %c0_25] : memref<9x8x4xf32, #tpu.memory_space<vmem>>, vector<1x8x4xf32>
    %67 = vector.shape_cast %66 : vector<1x8x4xf32> to vector<8x4xf32>
    %cst_26 = arith.constant dense<0.000000e+00> : vector<8x256xf32>
    %68 = tpu.matmul %67, %26, %cst_26 {dimension_numbers = #tpu.dot_dimension_numbers<[1], [0], [0], [1], [0, 0, 1, 1], [], []>} : vector<8x4xf32>, vector<4x256xf32>, vector<8x256xf32> -> vector<8x256xf32>
    %69 = arith.addf %65, %68 : vector<8x256xf32>
    %c5 = arith.constant 5 : index
    %c0_27 = arith.constant 0 : index
    %c0_28 = arith.constant 0 : index
    %70 = vector.load %arg2[%c5, %c0_27, %c0_28] : memref<9x8x4xf32, #tpu.memory_space<vmem>>, vector<1x8x4xf32>
    %71 = vector.shape_cast %70 : vector<1x8x4xf32> to vector<8x4xf32>
    %cst_29 = arith.constant dense<0.000000e+00> : vector<8x256xf32>
    %72 = tpu.matmul %71, %61, %cst_29 {dimension_numbers = #tpu.dot_dimension_numbers<[1], [0], [0], [1], [0, 0, 1, 1], [], []>} : vector<8x4xf32>, vector<4x256xf32>, vector<8x256xf32> -> vector<8x256xf32>
    %73 = arith.addf %69, %72 : vector<8x256xf32>
    %c1_i32_30 = arith.constant 1 : i32
    %74 = tpu.dynamic_rotate %34 by %c1_i32_30 dim 1 : vector<4x256xf32>, i32 -> vector<4x256xf32>
    %75 = vector.shape_cast %22 : vector<1x256xi1> to vector<1x256xi1>
    %76 = vector.broadcast %75 : vector<1x256xi1> to vector<4x256xi1>
    %77 = arith.select %76, %34, %74 : vector<4x256xi1>, vector<4x256xf32>
    %c255_i32_31 = arith.constant 255 : i32
    %78 = tpu.dynamic_rotate %34 by %c255_i32_31 dim 1 : vector<4x256xf32>, i32 -> vector<4x256xf32>
    %79 = vector.shape_cast %24 : vector<1x256xi1> to vector<1x256xi1>
    %80 = vector.broadcast %79 : vector<1x256xi1> to vector<4x256xi1>
    %81 = arith.select %80, %34, %78 : vector<4x256xi1>, vector<4x256xf32>
    %c6 = arith.constant 6 : index
    %c0_32 = arith.constant 0 : index
    %c0_33 = arith.constant 0 : index
    %82 = vector.load %arg2[%c6, %c0_32, %c0_33] : memref<9x8x4xf32, #tpu.memory_space<vmem>>, vector<1x8x4xf32>
    %83 = vector.shape_cast %82 : vector<1x8x4xf32> to vector<8x4xf32>
    %cst_34 = arith.constant dense<0.000000e+00> : vector<8x256xf32>
    %84 = tpu.matmul %83, %77, %cst_34 {dimension_numbers = #tpu.dot_dimension_numbers<[1], [0], [0], [1], [0, 0, 1, 1], [], []>} : vector<8x4xf32>, vector<4x256xf32>, vector<8x256xf32> -> vector<8x256xf32>
    %85 = arith.addf %73, %84 : vector<8x256xf32>
    %c7 = arith.constant 7 : index
    %c0_35 = arith.constant 0 : index
    %c0_36 = arith.constant 0 : index
    %86 = vector.load %arg2[%c7, %c0_35, %c0_36] : memref<9x8x4xf32, #tpu.memory_space<vmem>>, vector<1x8x4xf32>
    %87 = vector.shape_cast %86 : vector<1x8x4xf32> to vector<8x4xf32>
    %cst_37 = arith.constant dense<0.000000e+00> : vector<8x256xf32>
    %88 = tpu.matmul %87, %34, %cst_37 {dimension_numbers = #tpu.dot_dimension_numbers<[1], [0], [0], [1], [0, 0, 1, 1], [], []>} : vector<8x4xf32>, vector<4x256xf32>, vector<8x256xf32> -> vector<8x256xf32>
    %89 = arith.addf %85, %88 : vector<8x256xf32>
    %c8 = arith.constant 8 : index
    %c0_38 = arith.constant 0 : index
    %c0_39 = arith.constant 0 : index
    %90 = vector.load %arg2[%c8, %c0_38, %c0_39] : memref<9x8x4xf32, #tpu.memory_space<vmem>>, vector<1x8x4xf32>
    %91 = vector.shape_cast %90 : vector<1x8x4xf32> to vector<8x4xf32>
    %cst_40 = arith.constant dense<0.000000e+00> : vector<8x256xf32>
    %92 = tpu.matmul %91, %81, %cst_40 {dimension_numbers = #tpu.dot_dimension_numbers<[1], [0], [0], [1], [0, 0, 1, 1], [], []>} : vector<8x4xf32>, vector<4x256xf32>, vector<8x256xf32> -> vector<8x256xf32>
    %93 = arith.addf %89, %92 : vector<8x256xf32>
    %c0_41 = arith.constant 0 : index
    %c0_42 = arith.constant 0 : index
    %94 = vector.load %arg3[%c0_41, %c0_42] : memref<8x1xf32, #tpu.memory_space<vmem>>, vector<8x1xf32>
    %95 = vector.broadcast %94 : vector<8x1xf32> to vector<8x256xf32>
    %96 = arith.addf %93, %95 : vector<8x256xf32>
    %cst_43 = arith.constant 0.000000e+00 : f32
    %97 = vector.broadcast %cst_43 : f32 to vector<8x256xf32>
    %98 = arith.maximumf %96, %97 : vector<8x256xf32>
    %c16_i32_44 = arith.constant 16 : i32
    %99 = tpu.dynamic_rotate %98 by %c16_i32_44 dim 1 : vector<8x256xf32>, i32 -> vector<8x256xf32>
    %100 = vector.shape_cast %18 : vector<1x256xi1> to vector<1x256xi1>
    %101 = vector.broadcast %100 : vector<1x256xi1> to vector<8x256xi1>
    %102 = arith.select %101, %98, %99 : vector<8x256xi1>, vector<8x256xf32>
    %c16_i32_45 = arith.constant 16 : i32
    %103 = tpu.dynamic_rotate %102 by %c16_i32_45 dim 1 : vector<8x256xf32>, i32 -> vector<8x256xf32>
    %104 = vector.shape_cast %18 : vector<1x256xi1> to vector<1x256xi1>
    %105 = vector.broadcast %104 : vector<1x256xi1> to vector<8x256xi1>
    %106 = arith.select %105, %102, %103 : vector<8x256xi1>, vector<8x256xf32>
    %c240_i32_46 = arith.constant 240 : i32
    %107 = tpu.dynamic_rotate %98 by %c240_i32_46 dim 1 : vector<8x256xf32>, i32 -> vector<8x256xf32>
    %108 = vector.shape_cast %20 : vector<1x256xi1> to vector<1x256xi1>
    %109 = vector.broadcast %108 : vector<1x256xi1> to vector<8x256xi1>
    %110 = arith.select %109, %98, %107 : vector<8x256xi1>, vector<8x256xf32>
    %c240_i32_47 = arith.constant 240 : i32
    %111 = tpu.dynamic_rotate %110 by %c240_i32_47 dim 1 : vector<8x256xf32>, i32 -> vector<8x256xf32>
    %112 = vector.shape_cast %20 : vector<1x256xi1> to vector<1x256xi1>
    %113 = vector.broadcast %112 : vector<1x256xi1> to vector<8x256xi1>
    %114 = arith.select %113, %110, %111 : vector<8x256xi1>, vector<8x256xf32>
    %c1_i32_48 = arith.constant 1 : i32
    %115 = tpu.dynamic_rotate %106 by %c1_i32_48 dim 1 : vector<8x256xf32>, i32 -> vector<8x256xf32>
    %116 = vector.shape_cast %22 : vector<1x256xi1> to vector<1x256xi1>
    %117 = vector.broadcast %116 : vector<1x256xi1> to vector<8x256xi1>
    %118 = arith.select %117, %106, %115 : vector<8x256xi1>, vector<8x256xf32>
    %c1_i32_49 = arith.constant 1 : i32
    %119 = tpu.dynamic_rotate %118 by %c1_i32_49 dim 1 : vector<8x256xf32>, i32 -> vector<8x256xf32>
    %120 = vector.shape_cast %22 : vector<1x256xi1> to vector<1x256xi1>
    %121 = vector.broadcast %120 : vector<1x256xi1> to vector<8x256xi1>
    %122 = arith.select %121, %118, %119 : vector<8x256xi1>, vector<8x256xf32>
    %c255_i32_50 = arith.constant 255 : i32
    %123 = tpu.dynamic_rotate %106 by %c255_i32_50 dim 1 : vector<8x256xf32>, i32 -> vector<8x256xf32>
    %124 = vector.shape_cast %24 : vector<1x256xi1> to vector<1x256xi1>
    %125 = vector.broadcast %124 : vector<1x256xi1> to vector<8x256xi1>
    %126 = arith.select %125, %106, %123 : vector<8x256xi1>, vector<8x256xf32>
    %c255_i32_51 = arith.constant 255 : i32
    %127 = tpu.dynamic_rotate %126 by %c255_i32_51 dim 1 : vector<8x256xf32>, i32 -> vector<8x256xf32>
    %128 = vector.shape_cast %24 : vector<1x256xi1> to vector<1x256xi1>
    %129 = vector.broadcast %128 : vector<1x256xi1> to vector<8x256xi1>
    %130 = arith.select %129, %126, %127 : vector<8x256xi1>, vector<8x256xf32>
    %c0_52 = arith.constant 0 : index
    %c0_53 = arith.constant 0 : index
    %c0_54 = arith.constant 0 : index
    %131 = vector.load %arg4[%c0_52, %c0_53, %c0_54] : memref<9x12x8xf32, #tpu.memory_space<vmem>>, vector<1x12x8xf32>
    %132 = vector.shape_cast %131 : vector<1x12x8xf32> to vector<12x8xf32>
    %cst_55 = arith.constant dense<0.000000e+00> : vector<12x256xf32>
    %133 = tpu.matmul %132, %122, %cst_55 {dimension_numbers = #tpu.dot_dimension_numbers<[1], [0], [0], [1], [0, 0, 1, 1], [], []>} : vector<12x8xf32>, vector<8x256xf32>, vector<12x256xf32> -> vector<12x256xf32>
    %c1_56 = arith.constant 1 : index
    %c0_57 = arith.constant 0 : index
    %c0_58 = arith.constant 0 : index
    %134 = vector.load %arg4[%c1_56, %c0_57, %c0_58] : memref<9x12x8xf32, #tpu.memory_space<vmem>>, vector<1x12x8xf32>
    %135 = vector.shape_cast %134 : vector<1x12x8xf32> to vector<12x8xf32>
    %cst_59 = arith.constant dense<0.000000e+00> : vector<12x256xf32>
    %136 = tpu.matmul %135, %106, %cst_59 {dimension_numbers = #tpu.dot_dimension_numbers<[1], [0], [0], [1], [0, 0, 1, 1], [], []>} : vector<12x8xf32>, vector<8x256xf32>, vector<12x256xf32> -> vector<12x256xf32>
    %137 = arith.addf %133, %136 : vector<12x256xf32>
    %c2_60 = arith.constant 2 : index
    %c0_61 = arith.constant 0 : index
    %c0_62 = arith.constant 0 : index
    %138 = vector.load %arg4[%c2_60, %c0_61, %c0_62] : memref<9x12x8xf32, #tpu.memory_space<vmem>>, vector<1x12x8xf32>
    %139 = vector.shape_cast %138 : vector<1x12x8xf32> to vector<12x8xf32>
    %cst_63 = arith.constant dense<0.000000e+00> : vector<12x256xf32>
    %140 = tpu.matmul %139, %130, %cst_63 {dimension_numbers = #tpu.dot_dimension_numbers<[1], [0], [0], [1], [0, 0, 1, 1], [], []>} : vector<12x8xf32>, vector<8x256xf32>, vector<12x256xf32> -> vector<12x256xf32>
    %141 = arith.addf %137, %140 : vector<12x256xf32>
    %c1_i32_64 = arith.constant 1 : i32
    %142 = tpu.dynamic_rotate %98 by %c1_i32_64 dim 1 : vector<8x256xf32>, i32 -> vector<8x256xf32>
    %143 = vector.shape_cast %22 : vector<1x256xi1> to vector<1x256xi1>
    %144 = vector.broadcast %143 : vector<1x256xi1> to vector<8x256xi1>
    %145 = arith.select %144, %98, %142 : vector<8x256xi1>, vector<8x256xf32>
    %c1_i32_65 = arith.constant 1 : i32
    %146 = tpu.dynamic_rotate %145 by %c1_i32_65 dim 1 : vector<8x256xf32>, i32 -> vector<8x256xf32>
    %147 = vector.shape_cast %22 : vector<1x256xi1> to vector<1x256xi1>
    %148 = vector.broadcast %147 : vector<1x256xi1> to vector<8x256xi1>
    %149 = arith.select %148, %145, %146 : vector<8x256xi1>, vector<8x256xf32>
    %c255_i32_66 = arith.constant 255 : i32
    %150 = tpu.dynamic_rotate %98 by %c255_i32_66 dim 1 : vector<8x256xf32>, i32 -> vector<8x256xf32>
    %151 = vector.shape_cast %24 : vector<1x256xi1> to vector<1x256xi1>
    %152 = vector.broadcast %151 : vector<1x256xi1> to vector<8x256xi1>
    %153 = arith.select %152, %98, %150 : vector<8x256xi1>, vector<8x256xf32>
    %c255_i32_67 = arith.constant 255 : i32
    %154 = tpu.dynamic_rotate %153 by %c255_i32_67 dim 1 : vector<8x256xf32>, i32 -> vector<8x256xf32>
    %155 = vector.shape_cast %24 : vector<1x256xi1> to vector<1x256xi1>
    %156 = vector.broadcast %155 : vector<1x256xi1> to vector<8x256xi1>
    %157 = arith.select %156, %153, %154 : vector<8x256xi1>, vector<8x256xf32>
    %c3_68 = arith.constant 3 : index
    %c0_69 = arith.constant 0 : index
    %c0_70 = arith.constant 0 : index
    %158 = vector.load %arg4[%c3_68, %c0_69, %c0_70] : memref<9x12x8xf32, #tpu.memory_space<vmem>>, vector<1x12x8xf32>
    %159 = vector.shape_cast %158 : vector<1x12x8xf32> to vector<12x8xf32>
    %cst_71 = arith.constant dense<0.000000e+00> : vector<12x256xf32>
    %160 = tpu.matmul %159, %149, %cst_71 {dimension_numbers = #tpu.dot_dimension_numbers<[1], [0], [0], [1], [0, 0, 1, 1], [], []>} : vector<12x8xf32>, vector<8x256xf32>, vector<12x256xf32> -> vector<12x256xf32>
    %161 = arith.addf %141, %160 : vector<12x256xf32>
    %c4_72 = arith.constant 4 : index
    %c0_73 = arith.constant 0 : index
    %c0_74 = arith.constant 0 : index
    %162 = vector.load %arg4[%c4_72, %c0_73, %c0_74] : memref<9x12x8xf32, #tpu.memory_space<vmem>>, vector<1x12x8xf32>
    %163 = vector.shape_cast %162 : vector<1x12x8xf32> to vector<12x8xf32>
    %cst_75 = arith.constant dense<0.000000e+00> : vector<12x256xf32>
    %164 = tpu.matmul %163, %98, %cst_75 {dimension_numbers = #tpu.dot_dimension_numbers<[1], [0], [0], [1], [0, 0, 1, 1], [], []>} : vector<12x8xf32>, vector<8x256xf32>, vector<12x256xf32> -> vector<12x256xf32>
    %165 = arith.addf %161, %164 : vector<12x256xf32>
    %c5_76 = arith.constant 5 : index
    %c0_77 = arith.constant 0 : index
    %c0_78 = arith.constant 0 : index
    %166 = vector.load %arg4[%c5_76, %c0_77, %c0_78] : memref<9x12x8xf32, #tpu.memory_space<vmem>>, vector<1x12x8xf32>
    %167 = vector.shape_cast %166 : vector<1x12x8xf32> to vector<12x8xf32>
    %cst_79 = arith.constant dense<0.000000e+00> : vector<12x256xf32>
    %168 = tpu.matmul %167, %157, %cst_79 {dimension_numbers = #tpu.dot_dimension_numbers<[1], [0], [0], [1], [0, 0, 1, 1], [], []>} : vector<12x8xf32>, vector<8x256xf32>, vector<12x256xf32> -> vector<12x256xf32>
    %169 = arith.addf %165, %168 : vector<12x256xf32>
    %c1_i32_80 = arith.constant 1 : i32
    %170 = tpu.dynamic_rotate %114 by %c1_i32_80 dim 1 : vector<8x256xf32>, i32 -> vector<8x256xf32>
    %171 = vector.shape_cast %22 : vector<1x256xi1> to vector<1x256xi1>
    %172 = vector.broadcast %171 : vector<1x256xi1> to vector<8x256xi1>
    %173 = arith.select %172, %114, %170 : vector<8x256xi1>, vector<8x256xf32>
    %c1_i32_81 = arith.constant 1 : i32
    %174 = tpu.dynamic_rotate %173 by %c1_i32_81 dim 1 : vector<8x256xf32>, i32 -> vector<8x256xf32>
    %175 = vector.shape_cast %22 : vector<1x256xi1> to vector<1x256xi1>
    %176 = vector.broadcast %175 : vector<1x256xi1> to vector<8x256xi1>
    %177 = arith.select %176, %173, %174 : vector<8x256xi1>, vector<8x256xf32>
    %c255_i32_82 = arith.constant 255 : i32
    %178 = tpu.dynamic_rotate %114 by %c255_i32_82 dim 1 : vector<8x256xf32>, i32 -> vector<8x256xf32>
    %179 = vector.shape_cast %24 : vector<1x256xi1> to vector<1x256xi1>
    %180 = vector.broadcast %179 : vector<1x256xi1> to vector<8x256xi1>
    %181 = arith.select %180, %114, %178 : vector<8x256xi1>, vector<8x256xf32>
    %c255_i32_83 = arith.constant 255 : i32
    %182 = tpu.dynamic_rotate %181 by %c255_i32_83 dim 1 : vector<8x256xf32>, i32 -> vector<8x256xf32>
    %183 = vector.shape_cast %24 : vector<1x256xi1> to vector<1x256xi1>
    %184 = vector.broadcast %183 : vector<1x256xi1> to vector<8x256xi1>
    %185 = arith.select %184, %181, %182 : vector<8x256xi1>, vector<8x256xf32>
    %c6_84 = arith.constant 6 : index
    %c0_85 = arith.constant 0 : index
    %c0_86 = arith.constant 0 : index
    %186 = vector.load %arg4[%c6_84, %c0_85, %c0_86] : memref<9x12x8xf32, #tpu.memory_space<vmem>>, vector<1x12x8xf32>
    %187 = vector.shape_cast %186 : vector<1x12x8xf32> to vector<12x8xf32>
    %cst_87 = arith.constant dense<0.000000e+00> : vector<12x256xf32>
    %188 = tpu.matmul %187, %177, %cst_87 {dimension_numbers = #tpu.dot_dimension_numbers<[1], [0], [0], [1], [0, 0, 1, 1], [], []>} : vector<12x8xf32>, vector<8x256xf32>, vector<12x256xf32> -> vector<12x256xf32>
    %189 = arith.addf %169, %188 : vector<12x256xf32>
    %c7_88 = arith.constant 7 : index
    %c0_89 = arith.constant 0 : index
    %c0_90 = arith.constant 0 : index
    %190 = vector.load %arg4[%c7_88, %c0_89, %c0_90] : memref<9x12x8xf32, #tpu.memory_space<vmem>>, vector<1x12x8xf32>
    %191 = vector.shape_cast %190 : vector<1x12x8xf32> to vector<12x8xf32>
    %cst_91 = arith.constant dense<0.000000e+00> : vector<12x256xf32>
    %192 = tpu.matmul %191, %114, %cst_91 {dimension_numbers = #tpu.dot_dimension_numbers<[1], [0], [0], [1], [0, 0, 1, 1], [], []>} : vector<12x8xf32>, vector<8x256xf32>, vector<12x256xf32> -> vector<12x256xf32>
    %193 = arith.addf %189, %192 : vector<12x256xf32>
    %c8_92 = arith.constant 8 : index
    %c0_93 = arith.constant 0 : index
    %c0_94 = arith.constant 0 : index
    %194 = vector.load %arg4[%c8_92, %c0_93, %c0_94] : memref<9x12x8xf32, #tpu.memory_space<vmem>>, vector<1x12x8xf32>
    %195 = vector.shape_cast %194 : vector<1x12x8xf32> to vector<12x8xf32>
    %cst_95 = arith.constant dense<0.000000e+00> : vector<12x256xf32>
    %196 = tpu.matmul %195, %185, %cst_95 {dimension_numbers = #tpu.dot_dimension_numbers<[1], [0], [0], [1], [0, 0, 1, 1], [], []>} : vector<12x8xf32>, vector<8x256xf32>, vector<12x256xf32> -> vector<12x256xf32>
    %197 = arith.addf %193, %196 : vector<12x256xf32>
    %c0_96 = arith.constant 0 : index
    %c0_97 = arith.constant 0 : index
    %198 = vector.load %arg5[%c0_96, %c0_97] : memref<12x1xf32, #tpu.memory_space<vmem>>, vector<12x1xf32>
    %199 = vector.broadcast %198 : vector<12x1xf32> to vector<12x256xf32>
    %200 = arith.addf %197, %199 : vector<12x256xf32>
    %cst_98 = arith.constant 0.000000e+00 : f32
    %201 = vector.broadcast %cst_98 : f32 to vector<12x256xf32>
    %202 = arith.maximumf %200, %201 : vector<12x256xf32>
    %c0_99 = arith.constant 0 : index
    %c0_100 = arith.constant 0 : index
    %203 = vector.load %arg6[%c0_99, %c0_100] : memref<16x12xf32, #tpu.memory_space<vmem>>, vector<16x12xf32>
    %cst_101 = arith.constant dense<0.000000e+00> : vector<16x256xf32>
    %204 = tpu.matmul %203, %202, %cst_101 {dimension_numbers = #tpu.dot_dimension_numbers<[1], [0], [0], [1], [0, 0, 1, 1], [], []>} : vector<16x12xf32>, vector<12x256xf32>, vector<16x256xf32> -> vector<16x256xf32>
    %c0_102 = arith.constant 0 : index
    %c0_103 = arith.constant 0 : index
    %205 = vector.load %arg7[%c0_102, %c0_103] : memref<16x1xf32, #tpu.memory_space<vmem>>, vector<16x1xf32>
    %206 = vector.broadcast %205 : vector<16x1xf32> to vector<16x256xf32>
    %207 = arith.addf %204, %206 : vector<16x256xf32>
    %cst_104 = arith.constant 0.000000e+00 : f32
    %208 = vector.broadcast %cst_104 : f32 to vector<16x256xf32>
    %209 = arith.maximumf %207, %208 : vector<16x256xf32>
    %c0_105 = arith.constant 0 : index
    %c0_106 = arith.constant 0 : index
    %c0_107 = arith.constant 0 : index
    %210 = vector.load %arg8[%c0_105, %c0_106, %c0_107] : memref<1x16x256xf32, #tpu.memory_space<vmem>>, vector<1x16x256xf32>
    %211 = vector.shape_cast %210 : vector<1x16x256xf32> to vector<16x256xf32>
    %212 = vector.shape_cast %209 : vector<16x256xf32> to vector<1x16x256xf32>
    tpu.vector_store %arg8[%c0_105, %c0_106, %c0_107], %212 {strides = array<i32>} : memref<1x16x256xf32, #tpu.memory_space<vmem>>, vector<1x16x256xf32>,
    return
  }
  func.func @transform_0(%arg0: i32) -> (i32, i32, i32) {
    %c0_i32 = arith.constant 0 : i32
    %c0_i32_0 = arith.constant 0 : i32
    %c0_i32_1 = arith.constant 0 : i32
    return %arg0, %c0_i32, %c0_i32_0 : i32, i32, i32
  }
  func.func @transform_1(%arg0: i32) -> (i32, i32, i32) {
    %c0_i32 = arith.constant 0 : i32
    %c0_i32_0 = arith.constant 0 : i32
    %c0_i32_1 = arith.constant 0 : i32
    %c0_i32_2 = arith.constant 0 : i32
    return %c0_i32, %c0_i32_0, %c0_i32_1 : i32, i32, i32
  }
  func.func @transform_2(%arg0: i32) -> (i32, i32) {
    %c0_i32 = arith.constant 0 : i32
    %c0_i32_0 = arith.constant 0 : i32
    %c0_i32_1 = arith.constant 0 : i32
    return %c0_i32, %c0_i32_0 : i32, i32
  }
  func.func @transform_3(%arg0: i32) -> (i32, i32, i32) {
    %c0_i32 = arith.constant 0 : i32
    %c0_i32_0 = arith.constant 0 : i32
    %c0_i32_1 = arith.constant 0 : i32
    %c0_i32_2 = arith.constant 0 : i32
    return %c0_i32, %c0_i32_0, %c0_i32_1 : i32, i32, i32
  }
  func.func @transform_4(%arg0: i32) -> (i32, i32) {
    %c0_i32 = arith.constant 0 : i32
    %c0_i32_0 = arith.constant 0 : i32
    %c0_i32_1 = arith.constant 0 : i32
    return %c0_i32, %c0_i32_0 : i32, i32
  }
  func.func @transform_5(%arg0: i32) -> (i32, i32) {
    %c0_i32 = arith.constant 0 : i32
    %c0_i32_0 = arith.constant 0 : i32
    %c0_i32_1 = arith.constant 0 : i32
    return %c0_i32, %c0_i32_0 : i32, i32
  }
  func.func @transform_6(%arg0: i32) -> (i32, i32) {
    %c0_i32 = arith.constant 0 : i32
    %c0_i32_0 = arith.constant 0 : i32
    %c0_i32_1 = arith.constant 0 : i32
    return %c0_i32, %c0_i32_0 : i32, i32
  }
  func.func @transform_7(%arg0: i32) -> (i32, i32, i32) {
    %c0_i32 = arith.constant 0 : i32
    %c0_i32_0 = arith.constant 0 : i32
    %c0_i32_1 = arith.constant 0 : i32
    return %arg0, %c0_i32, %c0_i32_0 : i32, i32, i32
  }
}

</mosaic_0001>

<bundles_post_ra>
// kernel: tpu_custom_call.1
= control target key start
LH: loop header
LB: loop body
LE: loop exit
PB: predicated region body
PF: predicated region fallthrough
CT: control target
= control target key end

     0   :  { %12 = vsyncpa [#allocation3], 0  ;;  %s3237_s0 = inlined_call_operand.vmem [shape: f32[2,4,256], index: 0, kind: input, shape index: {}]   ;;  %s3238_s1 = inlined_call_operand.vmem [shape: f32[9,8,4], index: 1, kind: input, shape index: {}]   ;;  %s3239_s2 = inlined_call_operand.vmem [shape: f32[8,1], index: 2, kind: input, shape index: {}]   ;;  %s3240_s3 = inlined_call_operand.vmem [shape: f32[9,12,8], index: 3, kind: input, shape index: {}]   ;;  %s3241_s4 = inlined_call_operand.vmem [shape: f32[12,1], index: 4, kind: input, shape index: {}]   ;;  %s3242_s5 = inlined_call_operand.vmem [shape: f32[16,12], index: 5, kind: input, shape index: {}]   ;;  %s3243_s6 = inlined_call_operand.vmem [shape: f32[16,1], index: 6, kind: input, shape index: {}]   ;;  %s3244_s7 = inlined_call_operand.hbm [shape: f32[2,16,256], index: 7, kind: output, shape index: {}]  }
   0x1   :  { %14 = vsyncpa [#allocation3 + $0x1], 0  ;;  %s2602_s24 = smov 0   ;;  %s2604_s25 = smov 0  }
   0x2   :  { %s2606_s26 = smov 0   ;;  %s2608_s27 = smov 0  }
   0x3 LB: > { %s2623_s28 = sadd.s32 4294967295, %s2551_s27   ;;  %s2298_s29 = sadd.s32 4294967294, %s2551_s27   ;;  %s2551_s27 = sphi %s2608_s27, %s3258_s27   ;;  %s2547_s26 = sphi %s2606_s26, %s3257_s26   ;;  %s2543_s25 = sphi %s2604_s25, %s3256_s25   ;;  %s2539_s24 = sphi %s2602_s24, %s3255_s24  }
   0x4   : > { %s2627_s30 = sadd.s32 1, %s2551_s27   ;;  %s179_s8 = sadd.s32 1, %s2547_s26 }
   0x5   : > { %s176_s9 = ssub.s32 %s2551_s27, %s2627_s30  ;;  %p189_p0 = scmp.ne.s32.totalorder %s2547_s26, %s2543_s25 }
   0x6   : > { %p177_p1 = scmp.eq.s32.totalorder %s176_s9, 0  ;;  %p190_p2 = scmp.eq.s32.totalorder %s2623_s28, 1 }
   0x7   : > { %p195_p3 = scmp.ne.s32.totalorder %s2543_s25, %s2539_s24  ;;  %p196_p4 = scmp.eq.s32.totalorder %s2298_s29, 1 }
   0x8   : > { %s2638_s10 = scalar_select %p177_p1, %s2547_s26, %s179_s8  }
   0x9   : > { %p2640_p5 = por %p190_p2, %p189_p0  ;;  %p2644_p6 = por %p196_p4, %p195_p3 }
   0xa   : > { %p2301_p7 = scmp.ge.s32.totalorder %s2551_s27, 1  ;;  %p240_p8 = scmp.lt.s32.totalorder %s2551_s27, 3 }
   0xc   : > { %p241_p9 = pnand %p2301_p7, %p240_p8 }
   0xd   : > { %p272_p10 = scmp.lt.s32.totalorder (!%p241_p9), %s2623_s28, 1  ;;  %s2553_s18 = smov (!%p241_p9), 16   ;;  %v2555_v2 = vmov (!%p241_p9), 0.0   ;;  %v277_v3 = vlaneseq (!%p241_p9)  ;;  %vm374_vm1 = vcmask (!%p241_p9), 1043456   ;;  %v2305_v9 = vld [vmem:[%s3238_s1 + $0x8] sm:$0xff] (!%p241_p9)  ;;  %vm370_vm2 = vcmask (!%p241_p9), 31744  }
   0xe   : > { %244 = sbr.rel (%p241_p9) target bundleno = 1525 (0x5f5), region = 48  ;;  %s2554_s19 = smov (!%p241_p9), 112   ;;  %445 = vmatprep.mubr.f32.mxu0 (!%p241_p9), %v2555_v2  ;;  %1469 = vmatprep.mubr.f32.mxu1 (!%p241_p9), %v2555_v2  ;;  %v1150_v17 = vld [vmem:[%s3239_s2] sm:$0xff] (!%p241_p9)  ;;  %v2558_v18 = vmov (!%p241_p9), 0   ;;  %v2312_v42 = vld [vmem:[%s3238_s1 + $0x10] sm:$0xff] (!%p241_p9)  ;;  %v2316_v48 = vld [vmem:[%s3238_s1 + $0x18] sm:$0xff] (!%p241_p9) }
   0xf   : > { %v2671_v4 = vand.u32 (!%p241_p9), 127, %v277_v3  ;;  %s2556_s22 = smov (!%p241_p9), 1   ;;  %s2557_s23 = smov (!%p241_p9), 127   ;;  %2486 = vset.pattern.permute.xlu0 (!%p241_p9), %v2558_v18  ;;  %2487 = vset.pattern.permute.xlu1 (!%p241_p9), %v2558_v18  ;;  %v367_v29 = vld [vmem:[%s3238_s1] sm:$0xff] (!%p241_p9)  ;;  %v2324_v58 = vld [vmem:[%s3238_s1 + $0x28] sm:$0xff] (!%p241_p9)  ;;  %v2328_v62 = vld [vmem:[%s3238_s1 + $0x30] sm:$0xff] (!%p241_p9) }
  0x10   : > { %v2320_v53 = vld [vmem:[%s3238_s1 + $0x20] sm:$0xff] (!%p241_p9)  ;;  %v2332_v3 = vld [vmem:[%s3238_s1 + $0x38] sm:$0xff] (!%p241_p9)  ;;  %vm1229_vm11 = vcmask (!%p241_p9), 64512   ;;  %v2371_v32 = vld [vmem:[%s3240_s3 + $0x88] sm:$0xf] (!%p241_p9)  ;;  %vm2559_vm12 = vmmov (!%p241_p9), 1  }
  0x11   : > { %vm304_vm0 = vcmp.lt.s32.totalorder (!%p241_p9), %v2671_v4, 16  ;;  %v2693_v12 = vadd.s32 (!%p241_p9), 128, %v2671_v4  ;;  %vm332_vm3 = vcmp.lt.s32.totalorder (!%p241_p9), %v2671_v4, 112  ;;  %v284_v20 = vand.u32 (!%p241_p9), 15, %v2671_v4  ;;  %v2362_v23 = vld [vmem:[%s3240_s3 + $0x60] sm:$0xff] (!%p241_p9)  ;;  %vm2386_vm13 = vmpackc.low (!%p241_p9), %vm374_vm1, %vm2559_vm12 }
  0x12   : > { %vm345_vm5 = vcmp.lt.s32.totalorder (!%p241_p9), %v2671_v4, 1  ;;  %vm358_vm8 = vcmp.lt.s32.totalorder (!%p241_p9), %v2671_v4, 127  ;;  %v2367_v4 = vld [vmem:[%s3240_s3 + $0x78] sm:$0xf] (!%p241_p9)  ;;  %vm2124_vm14 = vcmask (!%p241_p9), 97280  }
  0x13   : > { %vm307_vm4 = vcmp.ge.s32.totalorder (!%p241_p9), %v2693_v12, 240  ;;  %v291_v19 = vand.u32 (!%p241_p9), 15, %v2693_v12  ;;  %vm2734_vm7 = vcmp.eq.s32.totalorder (!%p241_p9), %v284_v20, 0  ;;  %vm2755_vm10 = vcmp.eq.s32.totalorder (!%p241_p9), %v284_v20, 15 }
  0x15   : > { %s273_s13 = scalar_select %p272_p10, %s2623_s28, 1  ;;  %vm2730_vm6 = vcmp.eq.s32.totalorder %v291_v19, 0  ;;  %vm2750_vm9 = vcmp.eq.s32.totalorder %v291_v19, 15 }
  0x17   : > { %s2383_s14 = sshll.u32 %s273_s13, 3 }
  0x18   : > { %s276_s17 = scalar_lea.vmem %s3237_s0, %s2383_s14 }
  0x19   : > { %v2655_v0 = vld [vmem:[%s276_s17] sm:$0xff] }
  0x1a   : > { %316 = vrot.lane.b32.xlu0 %v2655_v0, %s2553_s18  ;;  %v2661_v1 = vcombine.high %v2655_v0, %v2655_v0  ;;  %328 = vrot.lane.b32.xlu1 %v2655_v0, %s2554_s19 }
  0x1e   : > { %318 = vrot.lane.b32.xlu0 %v2661_v1, %s2553_s18  ;;  %330 = vrot.lane.b32.xlu1 %v2661_v1, %s2554_s19 }
  0x8c   : > { %v317_v5 = vpop.permute.xlu0 %316  ;;  %v329_v11 = vpop.permute.xlu1 %328 }
  0x90   : > { %v319_v6 = vpop.permute.xlu0 %318  ;;  %v331_v13 = vpop.permute.xlu1 %330 }
  0x91   : > { %v320_v7 = vsel %vm304_vm0, %v317_v5, %v319_v6  ;;  %v321_v8 = vsel %vm304_vm0, %v319_v6, %v317_v5  ;;  %v334_v14 = vsel %vm332_vm3, %v331_v13, %v329_v11  ;;  %v2714_v16 = vsel %vm332_vm3, %v329_v11, %v331_v13  ;;  %v2336_v6 = vld [vmem:[%s3238_s1 + $0x40] sm:$0xff] }
  0x92   : > { %v326_v10 = vsel %vm304_vm0, %v2655_v0, %v321_v8  ;;  %343 = vrot.lane.b32.xlu1 %v320_v7, %s2556_s22  ;;  %2306 = vmatprep.subr.msk.mxu0 %vm374_vm1, %v320_v7  ;;  %v2710_v15 = vsel %vm307_vm4, %v2661_v1, %v334_v14 }
  0x93   : > { %341 = vrot.lane.b32.xlu0 %v326_v10, %s2556_s22  ;;  %2307 = vmatpush1.msk.msra.mxu0 %vm374_vm1, %v326_v10 }
  0x94   : > { %2308 = vmatmul.mubr.msk.f32.vlgmr.msra.gmra.mrb[0].mxu0 %vm370_vm2, %v2305_v9 }
  0x95   : > { %525 = vmatprep.mubr.f32.mxu0 %v2555_v2 }
  0x96   : > { %356 = vrot.lane.b32.xlu1 %v320_v7, %s2557_s23 }
  0x97   : > { %354 = vrot.lane.b32.xlu0 %v326_v10, %s2557_s23 }
  0x9a   : > { %618 = vrot.lane.b32.xlu1 %v2661_v1, %s2556_s22 }
  0x9b   : > { %616 = vrot.lane.b32.xlu0 %v2655_v0, %s2556_s22 }
  0x9e   : > { %626 = vrot.lane.b32.xlu1 %v2661_v1, %s2557_s23 }
  0x9f   : > { %624 = vrot.lane.b32.xlu0 %v2655_v0, %s2557_s23 }
  0xa2   : > { %884 = vrot.lane.b32.xlu1 %v2710_v15, %s2556_s22 }
  0xa3   : > { %882 = vrot.lane.b32.xlu0 %v2714_v16, %s2556_s22 }
  0xa6   : > { %892 = vrot.lane.b32.xlu1 %v2710_v15, %s2557_s23 }
  0xa7   : > { %890 = vrot.lane.b32.xlu0 %v2714_v16, %s2557_s23 }
  0xab   : > { %1153 = vperm.xlu0 %2486, %v1150_v17  }
 0x104   : > { %v344_v22 = vpop.permute.xlu1 %343 }
 0x105   : > { %v342_v24 = vpop.permute.xlu0 %341 }
 0x106   : > { %v346_v25 = vsel %vm345_vm5, %v342_v24, %v344_v22  ;;  %v347_v26 = vsel %vm345_vm5, %v344_v22, %v342_v24 }
 0x107   : > { %v352_v27 = vsel %vm2734_vm7, %v326_v10, %v347_v26  ;;  %v353_v28 = vsel %vm2730_vm6, %v320_v7, %v346_v25 }
 0x108   : > { %v357_v31 = vpop.permute.xlu1 %356  ;;  %2309 = vmatprep.subr.msk.mxu0 %vm374_vm1, %v353_v28 }
 0x109   : > { %v355_v33 = vpop.permute.xlu0 %354  ;;  %2310 = vmatpush1.msk.msra.mxu0 %vm374_vm1, %v352_v27 }
 0x10a   : > { %v359_v34 = vsel %vm358_vm8, %v355_v33, %v357_v31  ;;  %v360_v35 = vsel %vm358_vm8, %v357_v31, %v355_v33  ;;  %2311 = vmatmul.mubr.msk.f32.vlgmr.msra.gmra.mrb[0].mxu0 %vm370_vm2, %v367_v29 }
 0x10b   : > { %v365_v36 = vsel %vm2755_vm10, %v326_v10, %v359_v34  ;;  %v366_v37 = vsel %vm2750_vm9, %v320_v7, %v360_v35  ;;  %607 = vmatprep.mubr.f32.mxu0 %v2555_v2 }
 0x10c   : > { %2313 = vmatprep.subr.msk.mxu0 %vm374_vm1, %v366_v37  ;;  %v619_v39 = vpop.permute.xlu1 %618 }
 0x10d   : > { %v617_v38 = vpop.permute.xlu0 %616  ;;  %2314 = vmatpush1.msk.msra.mxu0 %vm374_vm1, %v365_v36 }
 0x10e   : > { %v620_v40 = vsel %vm345_vm5, %v617_v38, %v619_v39  ;;  %v621_v41 = vsel %vm345_vm5, %v619_v39, %v617_v38 }
 0x10f   : > { %v623_v43 = vsel %vm2730_vm6, %v2661_v1, %v620_v40  ;;  %v622_v44 = vsel %vm2734_vm7, %v2655_v0, %v621_v41 }
 0x110   : > { %2317 = vmatprep.subr.msk.mxu0 %vm374_vm1, %v623_v43  ;;  %v627_v46 = vpop.permute.xlu1 %626 }
 0x111   : > { %v625_v45 = vpop.permute.xlu0 %624 }
 0x112   : > { %2315 = vmatmul.mubr.msk.f32.vlgmr.msra.gmra.mrb[0].mxu0 %vm370_vm2, %v2312_v42  ;;  %v629_v47 = vsel %vm358_vm8, %v627_v46, %v625_v45  ;;  %v628_v50 = vsel %vm358_vm8, %v625_v45, %v627_v46 }
 0x113   : > { %2318 = vmatpush1.msk.msra.mxu0 %vm374_vm1, %v622_v44  ;;  %707 = vmatprep.mubr.f32.mxu0 %v2555_v2  ;;  %v631_v49 = vsel %vm2750_vm9, %v2661_v1, %v629_v47  ;;  %v630_v54 = vsel %vm2755_vm10, %v2655_v0, %v628_v50 }
 0x114   : > { %2321 = vmatprep.subr.msk.mxu0 %vm374_vm1, %v2661_v1  ;;  %v885_v52 = vpop.permute.xlu1 %884 }
 0x115   : > { %v883_v51 = vpop.permute.xlu0 %882 }
 0x116   : > { %v886_v55 = vsel %vm345_vm5, %v883_v51, %v885_v52  ;;  %v887_v57 = vsel %vm345_vm5, %v885_v52, %v883_v51  ;;  %v2340_v52 = vld [vmem:[%s3240_s3 + $0x10] sm:$0xff] }
 0x117   : > { %v889_v56 = vsel %vm2730_vm6, %v2710_v15, %v886_v55  ;;  %v888_v59 = vsel %vm2734_vm7, %v2714_v16, %v887_v57 }
 0x118   : > { %v893_v61 = vpop.permute.xlu1 %892 }
 0x119   : > { %v891_v60 = vpop.permute.xlu0 %890 }
 0x11a   : > { %2319 = vmatmul.mubr.msk.f32.vlgmr.msra.gmra.mrb[0].mxu0 %vm370_vm2, %v2316_v48  ;;  %v895_v63 = vsel %vm358_vm8, %v893_v61, %v891_v60  ;;  %v894_v1 = vsel %vm358_vm8, %v891_v60, %v893_v61 }
 0x11b   : > { %2322 = vmatpush1.msk.msra.mxu0 %vm374_vm1, %v2655_v0  ;;  %789 = vmatprep.mubr.f32.mxu0 %v2555_v2  ;;  %v897_v0 = vsel %vm2750_vm9, %v2710_v15, %v895_v63  ;;  %v896_v5 = vsel %vm2755_vm10, %v2714_v16, %v894_v1 }
 0x11c   : > { %2325 = vmatprep.subr.msk.mxu0 %vm374_vm1, %v631_v49 }
 0x122   : > { %2323 = vmatmul.mubr.msk.f32.vlgmr.msra.gmra.mrb[0].mxu0 %vm370_vm2, %v2320_v53 }
 0x123   : > { %2326 = vmatpush1.msk.msra.mxu0 %vm374_vm1, %v630_v54  ;;  %873 = vmatprep.mubr.f32.mxu0 %v2555_v2 }
 0x124   : > { %2329 = vmatprep.subr.msk.mxu0 %vm374_vm1, %v889_v56 }
 0x12a   : > { %2327 = vmatmul.mubr.msk.f32.vlgmr.msra.gmra.mrb[0].mxu0 %vm370_vm2, %v2324_v58  ;;  %v1154_v7 = vpop.permute.xlu0 %1153 }
 0x12b   : > { %2330 = vmatpush1.msk.msra.mxu0 %vm374_vm1, %v888_v59  ;;  %973 = vmatprep.mubr.f32.mxu0 %v2555_v2 }
 0x12c   : > { %2333 = vmatprep.subr.msk.mxu0 %vm374_vm1, %v2710_v15 }
 0x132   : > { %2331 = vmatmul.mubr.msk.f32.vlgmr.msra.gmra.mrb[0].mxu0 %vm370_vm2, %v2328_v62 }
 0x133   : > { %2334 = vmatpush1.msk.msra.mxu0 %vm374_vm1, %v2714_v16  ;;  %1057 = vmatprep.mubr.f32.mxu0 %v2555_v2 }
 0x134   : > { %2337 = vmatprep.subr.msk.mxu0 %vm374_vm1, %v897_v0 }
 0x13a   : > { %2335 = vmatmul.mubr.msk.f32.vlgmr.msra.gmra.mrb[0].mxu0 %vm370_vm2, %v2332_v3 }
 0x13b   : > { %2338 = vmatpush1.msk.msra.mxu0 %vm374_vm1, %v896_v5  ;;  %1141 = vmatprep.mubr.f32.mxu0 %v2555_v2 }
 0x142   : > { %2339 = vmatmul.mubr.msk.f32.vlgmr.msra.gmra.mrb[0].mxu0 %vm370_vm2, %v2336_v6 }
 0x143   : > { %1300 = vmatprep.mubr.f32.mxu0 %v2555_v2 }
 0x215   : > { %v1143_v8 = vpop.f32.mrb[0].mxu0 }
 0x216   : > { %v1156_v9 = vadd.f32 %v1154_v7, %v1143_v8  ;;  %v1145_v10 = vpop.f32.mrb[1].mxu0 }
 0x217   : > { %v1157_v13 = vadd.f32 %v1154_v7, %v1145_v10 }
 0x218   : > { %v2863_v11 = vmax.f32 %v1156_v9, 0.0 }
 0x219   : > { %v2869_v14 = vmax.f32 %v1157_v13, 0.0 }
 0x21a   : > { %1176 = vrot.lane.b32.xlu0 %v2863_v11, %s2554_s19  ;;  %1160 = vrot.lane.b32.xlu1 %v2863_v11, %s2553_s18 }
 0x21e   : > { %1162 = vrot.lane.b32.xlu1 %v2869_v14, %s2553_s18 }
 0x222   : > { %1178 = vrot.lane.b32.xlu1 %v2869_v14, %s2554_s19 }
 0x28c   : > { %v1161_v15 = vpop.permute.xlu1 %1160  ;;  %v1177_v20 = vpop.permute.xlu0 %1176 }
 0x290   : > { %v1163_v16 = vpop.permute.xlu1 %1162 }
 0x291   : > { %v1165_v17 = vsel %vm304_vm0, %v1163_v16, %v1161_v15  ;;  %v1164_v18 = vsel %vm304_vm0, %v1161_v15, %v1163_v16  ;;  %v2090_v16 = vld [vmem:[%s3241_s4] sm:$0xff] }
 0x292   : > { %1170 = vrot.lane.b32.xlu1 %v1164_v18, %s2553_s18  ;;  %v1166_v19 = vsel %vm304_vm0, %v2863_v11, %v1165_v17  ;;  %v2112_v17 = vld [vmem:[%s3243_s6] sm:$0xff]  ;;  %v2341_v18 = vld [vmem:[%s3240_s3 + $0x18] sm:$0xf] }
 0x293   : > { %1168 = vrot.lane.b32.xlu0 %v1166_v19, %s2553_s18  ;;  %v2091_v19 = vld [vmem:[%s3241_s4 + $0x8] sm:$0xf] }
 0x294   : > { %v1179_v22 = vpop.permute.xlu1 %1178 }
 0x295   : > { %v1181_v24 = vsel %vm332_vm3, %v1179_v22, %v1177_v20  ;;  %v1180_v25 = vsel %vm332_vm3, %v1177_v20, %v1179_v22  ;;  %v2113_v20 = vld [vmem:[%s3243_s6 + $0x8] sm:$0xff] }
 0x296   : > { %v1183_v26 = vsel %vm307_vm4, %v2869_v14, %v1181_v24 }
 0x297   : > { %1186 = vrot.lane.b32.xlu1 %v1183_v26, %s2554_s19  ;;  %1184 = vrot.lane.b32.xlu0 %v1180_v25, %s2554_s19  ;;  %s2384_s19 = sshll.u32 %s2623_s28, 9  ;;  %s2560_s28 = smov [#allocation2]  }
 0x298   : > { %s3193_s21 = scalar_lea.hbm %s3244_s7, %s2384_s19  ;;  %s2493_s9 = sshll.u32 %s2560_s28, 4  ;;  %s2494_s9 = int_to_ptr.vmem [resolvable:$false] %s2493_s9 }
 0x299   : > { %s2495_s13 = scalar_lea.vmem %s2494_s9, 1024 }
 0x304   : > { %v1171_v27 = vpop.permute.xlu1 %1170 }
 0x305   : > { %v1169_v28 = vpop.permute.xlu0 %1168 }
 0x306   : > { %v2895_v29 = vsel %vm304_vm0, %v1169_v28, %v1171_v27  ;;  %v1173_v31 = vsel %vm304_vm0, %v1171_v27, %v1169_v28 }
 0x307   : > { %v2902_v33 = vsel %vm304_vm0, %v2863_v11, %v1173_v31  ;;  %1210 = vrot.lane.b32.xlu1 %v2895_v29, %s2557_s23  ;;  %1236 = vmatprep.subr.mxu0 %v2895_v29  ;;  %v2346_v31 = vld [vmem:[%s3240_s3 + $0x20] sm:$0xff] }
 0x308   : > { %1208 = vrot.lane.b32.xlu0 %v2902_v33, %s2557_s23  ;;  %1237 = vmatpush1.msra.mxu0 %v2902_v33 }
 0x309   : > { %v1185_v34 = vpop.permute.xlu0 %1184  ;;  %v1187_v35 = vpop.permute.xlu1 %1186  ;;  %2342 = vmatmul.mubr.msk.f32.vlgmr.msra.gmra.mrb[2].mxu0 %vm1229_vm11, %v2340_v52 }
 0x30a   : > { %v1189_v36 = vsel %vm332_vm3, %v1187_v35, %v1185_v34  ;;  %v2927_v38 = vsel %vm332_vm3, %v1185_v34, %v1187_v35  ;;  %1306 = vmatprep.mubr.f32.mxu0 %v2555_v2 }
 0x30b   : > { %1488 = vrot.lane.b32.xlu1 %v2869_v14, %s2556_s22  ;;  %v2923_v37 = vsel %vm307_vm4, %v2869_v14, %v1189_v36 }
 0x30c   : > { %1486 = vrot.lane.b32.xlu0 %v2863_v11, %s2556_s22 }
 0x30d   : > { %2343 = vmatmul.mubr.msk.f32.gmra.mrb[4].mxu0 %vm1229_vm11, %v2341_v18 }
 0x30e   : > { %1383 = vmatprep.mubr.f32.mxu0 %v2555_v2 }
 0x30f   : > { %1504 = vrot.lane.b32.xlu1 %v2869_v14, %s2557_s23 }
 0x310   : > { %1502 = vrot.lane.b32.xlu0 %v2863_v11, %s2557_s23 }
 0x313   : > { %1790 = vrot.lane.b32.xlu1 %v2923_v37, %s2556_s22 }
 0x314   : > { %1788 = vrot.lane.b32.xlu0 %v2927_v38, %s2556_s22 }
 0x317   : > { %1194 = vrot.lane.b32.xlu1 %v2895_v29, %s2556_s22 }
 0x318   : > { %1192 = vrot.lane.b32.xlu0 %v2902_v33, %s2556_s22 }
 0x31b   : > { %1806 = vrot.lane.b32.xlu1 %v2923_v37, %s2557_s23 }
 0x31c   : > { %1804 = vrot.lane.b32.xlu0 %v2927_v38, %s2557_s23 }
 0x379   : > { %v1211_v12 = vpop.permute.xlu1 %1210 }
 0x37a   : > { %v1209_v39 = vpop.permute.xlu0 %1208 }
 0x37b   : > { %v1212_v40 = vsel %vm358_vm8, %v1209_v39, %v1211_v12  ;;  %v1213_v41 = vsel %vm358_vm8, %v1211_v12, %v1209_v39 }
 0x37c   : > { %v1215_v42 = vsel %vm2750_vm9, %v2895_v29, %v1213_v41  ;;  %v1214_v43 = vsel %vm2755_vm10, %v2902_v33, %v1212_v40  ;;  %v2347_v41 = vld [vmem:[%s3240_s3 + $0x28] sm:$0xf] }
 0x37d   : > { %1218 = vrot.lane.b32.xlu1 %v1215_v42, %s2557_s23  ;;  %1216 = vrot.lane.b32.xlu0 %v1214_v43, %s2557_s23  ;;  %v1489_v44 = vpop.permute.xlu1 %1488 }
 0x37e   : > { %v1487_v45 = vpop.permute.xlu0 %1486 }
 0x37f   : > { %v1490_v46 = vsel %vm345_vm5, %v1487_v45, %v1489_v44  ;;  %v1491_v47 = vsel %vm345_vm5, %v1489_v44, %v1487_v45  ;;  %v2350_v44 = vld [vmem:[%s3240_s3 + $0x30] sm:$0xff] }
 0x380   : > { %v1492_v48 = vsel %vm2734_vm7, %v2863_v11, %v1491_v47  ;;  %v1493_v49 = vsel %vm2730_vm6, %v2869_v14, %v1490_v46 }
 0x381   : > { %1494 = vrot.lane.b32.xlu0 %v1492_v48, %s2556_s22  ;;  %1496 = vrot.lane.b32.xlu1 %v1493_v49, %s2556_s22  ;;  %v1505_v50 = vpop.permute.xlu1 %1504  ;;  %v2351_v49 = vld [vmem:[%s3240_s3 + $0x38] sm:$0xf] }
 0x382   : > { %v1503_v51 = vpop.permute.xlu0 %1502 }
 0x383   : > { %v1506_v53 = vsel %vm358_vm8, %v1503_v51, %v1505_v50  ;;  %v1507_v54 = vsel %vm358_vm8, %v1505_v50, %v1503_v51 }
 0x384   : > { %v1509_v55 = vsel %vm2750_vm9, %v2869_v14, %v1507_v54  ;;  %v1508_v56 = vsel %vm2755_vm10, %v2863_v11, %v1506_v53 }
 0x385   : > { %1512 = vrot.lane.b32.xlu1 %v1509_v55, %s2557_s23  ;;  %1510 = vrot.lane.b32.xlu0 %v1508_v56, %s2557_s23  ;;  %v1791_v57 = vpop.permute.xlu1 %1790  ;;  %v2354_v56 = vld [vmem:[%s3240_s3 + $0x40] sm:$0xff] }
 0x386   : > { %v1789_v58 = vpop.permute.xlu0 %1788 }
 0x387   : > { %v1792_v59 = vsel %vm345_vm5, %v1789_v58, %v1791_v57  ;;  %v1793_v60 = vsel %vm345_vm5, %v1791_v57, %v1789_v58  ;;  %v1224_v57 = vld [vmem:[%s3240_s3] sm:$0xff] }
 0x388   : > { %v1794_v61 = vsel %vm2734_vm7, %v2927_v38, %v1793_v60  ;;  %v1795_v62 = vsel %vm2730_vm6, %v2923_v37, %v1792_v59  ;;  %v2355_v59 = vld [vmem:[%s3240_s3 + $0x48] sm:$0xf] }
 0x389   : > { %1796 = vrot.lane.b32.xlu0 %v1794_v61, %s2556_s22  ;;  %1798 = vrot.lane.b32.xlu1 %v1795_v62, %s2556_s22  ;;  %v1195_v63 = vpop.permute.xlu1 %1194  ;;  %v1225_v60 = vld [vmem:[%s3240_s3 + $0x8] sm:$0xf]  ;;  %v2359_v62 = vld [vmem:[%s3240_s3 + $0x58] sm:$0xf] }
 0x38a   : > { %v1193_v0 = vpop.permute.xlu0 %1192 }
 0x38b   : > { %v1196_v1 = vsel %vm345_vm5, %v1193_v0, %v1195_v63  ;;  %v1197_v3 = vsel %vm345_vm5, %v1195_v63, %v1193_v0 }
 0x38c   : > { %v1198_v5 = vsel %vm2734_vm7, %v2902_v33, %v1197_v3  ;;  %v1199_v6 = vsel %vm2730_vm6, %v2895_v29, %v1196_v1 }
 0x38d   : > { %1200 = vrot.lane.b32.xlu0 %v1198_v5, %s2556_s22  ;;  %1202 = vrot.lane.b32.xlu1 %v1199_v6, %s2556_s22  ;;  %v1807_v7 = vpop.permute.xlu1 %1806  ;;  %v2363_v5 = vld [vmem:[%s3240_s3 + $0x68] sm:$0xf] }
 0x38e   : > { %v1805_v8 = vpop.permute.xlu0 %1804 }
 0x38f   : > { %v1808_v9 = vsel %vm358_vm8, %v1805_v8, %v1807_v7  ;;  %v1809_v10 = vsel %vm358_vm8, %v1807_v7, %v1805_v8  ;;  %v2366_v7 = vld [vmem:[%s3240_s3 + $0x70] sm:$0xff] }
 0x390   : > { %v1811_v13 = vsel %vm2750_vm9, %v2923_v37, %v1809_v10  ;;  %v1810_v15 = vsel %vm2755_vm10, %v2927_v38, %v1808_v9 }
 0x391   : > { %1814 = vrot.lane.b32.xlu1 %v1811_v13, %s2557_s23  ;;  %1812 = vrot.lane.b32.xlu0 %v1810_v15, %s2557_s23  ;;  %s269_s23 = sand.u32 1, %s2543_s25  }
 0x392   : > { %s2302_s15 = sshll.u32 %s269_s23, 5  ;;  %s3195_s29 = scalar_lea.sflag [#allocation3], %s269_s23 }
 0x393   : > { %s271_s16 = scalar_lea.vmem [#allocation2], %s2302_s15 }
 0x394   : > { %s2236_s17 = sshll.u32 %s271_s16, 4  ;;  %s3188_s17 = int_to_ptr.vmem [resolvable:$true] %s2236_s17 }
 0x395   : > { %2094 = vperm.xlu0 %2486, %v2090_v16   ;;  %2099 = vperm.xlu1 %2487, %v2091_v19   ;;  %s2489_s8 = scalar_lea.vmem %s3188_s17, 512  ;;  %p2496_p0 = scmp.lt.s32.totalorder %s3188_s17, %s2494_s9 }
 0x396   : > { %p2490_p11 = scmp.ne.s32.totalorder %s3188_s17, %s2489_s8  ;;  %p2497_p1 = scmp.lt.s32.totalorder %s2495_s13, %s2489_s8 }
 0x398   : > { %p2491_p12 = pnand %p2490_p11, %p2640_p5  ;;  %p2498_p2 = por %p2497_p1, %p2496_p0 }
 0x399   : > { %2116 = vperm.xlu0 %2486, %v2112_v17   ;;  %2121 = vperm.xlu1 %2487, %v2113_v20  }
 0x39a   : > { %p2492_p13 = pneg %p2491_p12 }
 0x39c   : > { %p2499_p3 = pnand %p2498_p2, %p2492_p13 }
 0x3ef   : > { %v1217_v22 = vpop.permute.xlu0 %1216  ;;  %v1219_v24 = vpop.permute.xlu1 %1218 }
 0x3f0   : > { %v1220_v25 = vsel %vm358_vm8, %v1217_v22, %v1219_v24  ;;  %v1221_v26 = vsel %vm358_vm8, %v1219_v24, %v1217_v22 }
 0x3f1   : > { %v1223_v27 = vsel %vm2750_vm9, %v2895_v29, %v1221_v26  ;;  %v1222_v28 = vsel %vm2755_vm10, %v2902_v33, %v1220_v25 }
 0x3f2   : > { %1405 = vmatprep.subr.mxu1 %v1223_v27 }
 0x3f3   : > { %v1495_v34 = vpop.permute.xlu0 %1494  ;;  %1406 = vmatpush1.msra.mxu1 %v1222_v28  ;;  %v1497_v35 = vpop.permute.xlu1 %1496 }
 0x3f4   : > { %v1498_v36 = vsel %vm345_vm5, %v1495_v34, %v1497_v35  ;;  %v1499_v12 = vsel %vm345_vm5, %v1497_v35, %v1495_v34  ;;  %2348 = vmatmul.mubr.msk.f32.vlgmr.msra.gmra.mrb[0].mxu1 %vm1229_vm11, %v2346_v31 }
 0x3f5   : > { %v1501_v39 = vsel %vm2730_vm6, %v2869_v14, %v1498_v36  ;;  %1475 = vmatprep.mubr.f32.mxu1 %v2555_v2  ;;  %v1500_v40 = vsel %vm2734_vm7, %v2863_v11, %v1499_v12 }
 0x3f6   : > { %1527 = vmatprep.subr.mxu1 %v1501_v39 }
 0x3f7   : > { %v1511_v42 = vpop.permute.xlu0 %1510  ;;  %1528 = vmatpush1.msra.mxu1 %v1500_v40  ;;  %v1513_v43 = vpop.permute.xlu1 %1512 }
 0x3f8   : > { %2349 = vmatmul.mubr.msk.f32.gmra.mrb[2].mxu1 %vm1229_vm11, %v2347_v41  ;;  %1617 = vmatprep.subr.mxu1 %v2869_v14  ;;  %v1515_v45 = vsel %vm358_vm8, %v1513_v43, %v1511_v42  ;;  %v2110_v41 = vld [vmem:[%s3242_s5] sm:$0xff] }
 0x3f9   : > { %1591 = vmatprep.mubr.f32.mxu1 %v2555_v2  ;;  %v1517_v48 = vsel %vm2750_vm9, %v2869_v14, %v1515_v45  ;;  %v1514_v14 = vsel %vm358_vm8, %v1511_v42, %v1513_v43  ;;  %v2111_v42 = vld [vmem:[%s3242_s5 + $0x8] sm:$0xff] }
 0x3fb   : > { %v1797_v46 = vpop.permute.xlu0 %1796  ;;  %v1799_v47 = vpop.permute.xlu1 %1798 }
 0x3fc   : > { %2352 = vmatmul.mubr.msk.f32.vlgmr.msra.gmra.mrb[0].mxu1 %vm1229_vm11, %v2350_v44  ;;  %v1800_v58 = vsel %vm345_vm5, %v1797_v46, %v1799_v47  ;;  %v1801_v21 = vsel %vm345_vm5, %v1799_v47, %v1797_v46 }
 0x3fd   : > { %1618 = vmatpush1.msra.mxu1 %v2863_v11  ;;  %1597 = vmatprep.mubr.f32.mxu1 %v2555_v2  ;;  %v1802_v61 = vsel %vm2734_vm7, %v2927_v38, %v1801_v21 }
 0x3fe   : > { %1707 = vmatprep.subr.mxu1 %v1517_v48 }
 0x3ff   : > { %v1201_v50 = vpop.permute.xlu0 %1200  ;;  %v1203_v51 = vpop.permute.xlu1 %1202 }
 0x400   : > { %v1204_v52 = vsel %vm345_vm5, %v1201_v50, %v1203_v51  ;;  %v1205_v53 = vsel %vm345_vm5, %v1203_v51, %v1201_v50  ;;  %2353 = vmatmul.mubr.msk.f32.gmra.mrb[2].mxu1 %vm1229_vm11, %v2351_v49 }
 0x401   : > { %v1207_v54 = vsel %vm2730_vm6, %v2895_v29, %v1204_v52  ;;  %v1206_v55 = vsel %vm2734_vm7, %v2902_v33, %v1205_v53  ;;  %1681 = vmatprep.mubr.f32.mxu1 %v2555_v2  ;;  %v1516_v29 = vsel %vm2755_vm10, %v2863_v11, %v1514_v14  ;;  %v1803_v33 = vsel %vm2730_vm6, %v2923_v37, %v1800_v58  ;;  %v2358_v11 = vld [vmem:[%s3240_s3 + $0x50] sm:$0xff] }
 0x402   : > { %1319 = vmatprep.subr.mxu0 %v1207_v54 }
 0x403   : > { %1320 = vmatpush1.msra.mxu0 %v1206_v55  ;;  %v1813_v63 = vpop.permute.xlu0 %1812  ;;  %v1815_v0 = vpop.permute.xlu1 %1814 }
 0x404   : > { %2356 = vmatmul.mubr.msk.f32.vlgmr.msra.gmra.mrb[0].mxu1 %vm1229_vm11, %v2354_v56  ;;  %2344 = vmatmul.mubr.msk.f32.vlgmr.msra.gmra.mrb[2].mxu0 %vm1229_vm11, %v1224_v57  ;;  %v1817_v1 = vsel %vm358_vm8, %v1815_v0, %v1813_v63  ;;  %v1816_v6 = vsel %vm358_vm8, %v1813_v63, %v1815_v0 }
 0x405   : > { %1708 = vmatpush1.msra.mxu1 %v1516_v29  ;;  %1687 = vmatprep.mubr.f32.mxu1 %v2555_v2  ;;  %v1819_v3 = vsel %vm2750_vm9, %v2923_v37, %v1817_v1  ;;  %v1818_v30 = vsel %vm2755_vm10, %v2927_v38, %v1816_v6 }
 0x406   : > { %1829 = vmatprep.subr.mxu1 %v1803_v33  ;;  %1389 = vmatprep.mubr.f32.mxu0 %v2555_v2 }
 0x408   : > { %2357 = vmatmul.mubr.msk.f32.gmra.mrb[2].mxu1 %vm1229_vm11, %v2355_v59  ;;  %2345 = vmatmul.mubr.msk.f32.gmra.mrb[4].mxu0 %vm1229_vm11, %v1225_v60 }
 0x409   : > { %1771 = vmatprep.mubr.f32.mxu1 %v2555_v2  ;;  %2201 = vmatprep.mubr.f32.mxu0 %v2555_v2 }
 0x40c   : > { %2360 = vmatmul.mubr.msk.f32.vlgmr.msra.gmra.mrb[0].mxu1 %vm1229_vm11, %v2358_v11 }
 0x40d   : > { %1830 = vmatpush1.msra.mxu1 %v1802_v61  ;;  %1777 = vmatprep.mubr.f32.mxu1 %v2555_v2 }
 0x40e   : > { %1919 = vmatprep.subr.mxu1 %v2923_v37  ;;  %v2370_v37 = vld [vmem:[%s3240_s3 + $0x80] sm:$0xff] }
 0x410   : > { %2361 = vmatmul.mubr.msk.f32.gmra.mrb[2].mxu1 %vm1229_vm11, %v2359_v62 }
 0x411   : > { %1893 = vmatprep.mubr.f32.mxu1 %v2555_v2 }
 0x414   : > { %2364 = vmatmul.mubr.msk.f32.vlgmr.msra.gmra.mrb[0].mxu1 %vm1229_vm11, %v2362_v23  ;;  %v2095_v18 = vpop.permute.xlu0 %2094  ;;  %v2100_v27 = vpop.permute.xlu1 %2099 }
 0x415   : > { %1920 = vmatpush1.msra.mxu1 %v2927_v38  ;;  %1899 = vmatprep.mubr.f32.mxu1 %v2555_v2 }
 0x416   : > { %2009 = vmatprep.subr.mxu1 %v1819_v3 }
 0x418   : > { %2365 = vmatmul.mubr.msk.f32.gmra.mrb[2].mxu1 %vm1229_vm11, %v2363_v5  ;;  %v2117_v43 = vpop.permute.xlu0 %2116  ;;  %v2122_v49 = vpop.permute.xlu1 %2121 }
 0x419   : > { %1983 = vmatprep.mubr.f32.mxu1 %v2555_v2 }
 0x41c   : > { %2368 = vmatmul.mubr.msk.f32.vlgmr.msra.gmra.mrb[0].mxu1 %vm1229_vm11, %v2366_v7 }
 0x41d   : > { %2010 = vmatpush1.msra.mxu1 %v1818_v30  ;;  %1989 = vmatprep.mubr.f32.mxu1 %v2555_v2 }
 0x420   : > { %2369 = vmatmul.mubr.msk.f32.gmra.mrb[2].mxu1 %vm1229_vm11, %v2367_v4 }
 0x421   : > { %2073 = vmatprep.mubr.f32.mxu1 %v2555_v2 }
 0x424   : > { %2372 = vmatmul.mubr.msk.f32.vlgmr.msra.gmra.mrb[0].mxu1 %vm1229_vm11, %v2370_v37 }
 0x425   : > { %2079 = vmatprep.mubr.f32.mxu1 %v2555_v2 }
 0x428   : > { %2373 = vmatmul.mubr.msk.f32.gmra.mrb[2].mxu1 %vm1229_vm11, %v2371_v32 }
 0x4d7   : > { %v1385_v38 = vpop.f32.mrb[2].mxu0 }
 0x4d8   : > { %v1387_v8 = vpop.f32.mrb[3].mxu0 }
 0x4db   : > { %v1391_v9 = vpop.f32.mrb[4].mxu0 }
 0x4dc   : > { %v1393_v10 = vpop.f32.mrb[5].mxu0 }
 0x4f7   : > { %v2075_v13 = vpop.f32.mrb[0].mxu1 }
 0x4f8   : > { %v2391_v15 = vadd.f32 %v2075_v13, %v1385_v38  ;;  %v2077_v16 = vpop.f32.mrb[1].mxu1 }
 0x4f9   : > { %v2392_v17 = vadd.f32 %v2077_v16, %v1387_v8 }
 0x4fa   : > { %v2102_v20 = vadd.f32 %v2391_v15, %v2095_v18 }
 0x4fb   : > { %v2081_v19 = vpop.f32.mrb[2].mxu1  ;;  %v2103_v25 = vadd.f32 %v2392_v17, %v2095_v18 }
 0x4fc   : > { %v2393_v22 = vadd.f32 %v2081_v19, %v1391_v9  ;;  %v2083_v24 = vpop.f32.mrb[3].mxu1  ;;  %v2106_v34 = vmax.f32 %v2102_v20, 0.0 }
 0x4fd   : > { %v2394_v26 = vadd.f32 %v2083_v24, %v1393_v10  ;;  %v2107_v36 = vmax.f32 %v2103_v25, 0.0 }
 0x4fe   : > { %v2104_v28 = vadd.f32 %v2393_v22, %v2100_v27 }
 0x4ff   : > { %v2105_v31 = vadd.f32 %v2394_v26, %v2100_v27 }
 0x500   : > { %v2108_v35 = vmax.f32 %v2104_v28, 0.0 }
 0x501   : > { %v2109_v12 = vmax.f32 %v2105_v31, 0.0 }
 0x502   : > { %v2388_v39 = vpack.c.bf16 %v2108_v35, %v2106_v34 }
 0x503   : > { %v2385_v40 = vpack.c.bf16 %v2109_v12, %v2107_v36 }
 0x505   : > { %2387 = vmatprep.subr.msk.bf16.mxu0 %vm2386_vm13, %v2385_v40 }
 0x506   : > { %2390 = vmatpush1.bf16.msk.msra.mxu0 %vm2386_vm13, %v2388_v39 }
 0x509   : > { %2376 = vmatmul.mubr.msk.f32.vlgmr.msra.gmra.mrb[6].mxu0 %vm2124_vm14, %v2110_v41 }
 0x50a   : > { %2207 = vmatprep.mubr.f32.mxu0 %v2555_v2 }
 0x50d   : > { %2377 = vmatmul.mubr.msk.f32.gmra.mrb[8].mxu0 %vm2124_vm14, %v2111_v42 }
 0x5dc   : > { %v2203_v44 = vpop.f32.mrb[6].mxu0 }
 0x5dd   : > { %v2204_v45 = vadd.f32 %v2203_v44, %v2117_v43  ;;  %v2205_v46 = vpop.f32.mrb[7].mxu0 }
 0x5de   : > { %v2206_v47 = vadd.f32 %v2205_v46, %v2117_v43 }
 0x5df   : > { %v2214_v48 = vmax.f32 %v2204_v45, 0.0 }
 0x5e0   : > { %v2215_v50 = vmax.f32 %v2206_v47, 0.0  ;;  %v2209_v51 = vpop.f32.mrb[8].mxu0 }
 0x5e1   : > { %2218 = vst [vmem:[%s271_s16] sm:$0xff] %v2214_v48  ;;  %v2210_v2 = vadd.f32 %v2209_v51, %v2122_v49  ;;  %v2211_v52 = vpop.f32.mrb[9].mxu0 }
 0x5e2   : > { %2219 = vst [vmem:[%s271_s16 + $0x8] sm:$0xff] %v2215_v50  ;;  %v2212_v53 = vadd.f32 %v2211_v52, %v2122_v49 }
 0x5e3   : > { %v2216_v14 = vmax.f32 %v2210_v2, 0.0 }
 0x5e4   : > { %v2217_v54 = vmax.f32 %v2212_v53, 0.0 }
 0x5e5   : > { %2220 = vst [vmem:[%s271_s16 + $0x10] sm:$0xff] %v2216_v14 }
 0x5e6   : > { %2221 = vst [vmem:[%s271_s16 + $0x18] sm:$0xff] %v2217_v54 }
 0x5e7   : > { %2502 = shalt.err (!%p2499_p3)
}
 0x5e8   : > { %s2503_s14 = scalar_lea.hbm %s3193_s21, 512  ;;  %s2507_s16 = scalar_lea.hbm %s3244_s7, 1024 }
 0x5e9   : > { %p2504_p4 = scmp.ne.s32.totalorder %s3193_s21, %s2503_s14  ;;  %p2508_p9 = scmp.lt.u32.totalorder %s3193_s21, %s3244_s7 }
 0x5ea   : > { %p2509_p10 = scmp.lt.u32.totalorder %s2507_s16, %s2503_s14  ;;  %p2511_p12 = scmp.lt.u32.totalorder %s2503_s14, %s3193_s21 }
 0x5eb   : > { %p2505_p7 = pnand %p2504_p4, %p2640_p5 }
 0x5ec   : > { %p2510_p11 = por %p2509_p10, %p2508_p9 }
 0x5ed   : > { %p2506_p8 = pneg %p2505_p7 }
 0x5ee   : > { %p2512_p13 = por %p2511_p12, %p2510_p11 }
 0x5f0   : > { %p2513_p0 = pnand %p2512_p13, %p2506_p8 }
 0x5f2   : > { %2516 = shalt.err (!%p2513_p0)
}
 0x5f3   : > { %s2561_s22 = smov 256  }
 0x5f4   : > { %2439 = dma.vmem_to_hbm [thread:$0]  (%p2640_p5), %s3188_s17, 512, %s3193_s21, %s3195_s29, %s2561_s22, %s2561_s22, %s2553_s18  }
 0x5f5 PF: > { %p2445_p1 = scmp.ge.s32.totalorder %s2551_s27, 2  ;;  %s2251_s8 = sand.u32 1, %s2539_s24  }
 0x5f6   : > { %s2252_s28 = scalar_lea.sflag [#allocation3], %s2251_s8 }
 0x5f7   : > { %p2442_p2 = pnand %p2445_p1, %p2644_p6 }
 0x5f9   : > { %2534 = dma.done.wait (!%p2442_p2), %s2252_s28, 512  }
 0x5fa   : > { %2536 = vsyncadd (!%p2442_p2), %s2252_s28, 4294966784  ;;  %p17_p3 = scmp.ge.s32.totalorder %s2627_s30, 4   ;;  %s3255_s24 = smov %s2543_s25 }
 0x5fb   : > { %s3256_s25 = smov %s2547_s26  ;;  %s3257_s26 = smov %s2638_s10 }
 0x5fc   : > { %s3258_s27 = smov %s2627_s30  ;;  %19 = sbr.rel (!%p17_p3) target bundleno = 3 (0x3), region = 99 }
 0x603   :  { %2257 = vsyncpa [#allocation3], 1 }
 0x604   :  { %2259 = vsyncpa [#allocation3 + $0x1], 1 }

</bundles_post_ra>
